<compile_context>
chip_gen: v5e
topology: v5e:2x2
jax: 0.10.0
libtpu: 0.0.40
codegen_flags: <defaults>
</compile_context>

<pallas_src>
import functools
import math

import jax
import jax.numpy as jnp
from jax.experimental import pallas as pl
from jax.experimental.pallas import tpu as pltpu


def _sparse_mlp_kernel(x_ref, w1a_ref, w1b_ref, w2a_ref, w2b_ref, o_ref):
    # Sparsifying weight products on the VPU (hidden under MXU work), bf16 for MXU.
    w1_eff = (w1a_ref[...] * w1b_ref[...]).astype(jnp.bfloat16)    # (H, D_in)
    w2_eff = (w2a_ref[...] * w2b_ref[...]).astype(jnp.bfloat16)    # (D_out, H)
    x = x_ref[...].astype(jnp.bfloat16)                            # (tm, D_in)

    # hidden = relu(X @ W1_eff.T): contract last dims of both operands
    # (no transposed weight copy materialized), f32 accumulation on the MXU.
    h = jax.lax.dot_general(x, w1_eff, (((1,), (1,)), ((), ())),
                            preferred_element_type=jnp.float32)    # (tm, H) f32
    h = jnp.maximum(h, 0.0).astype(jnp.bfloat16)

    # out = hidden @ W2_eff.T
    o = jax.lax.dot_general(h, w2_eff, (((1,), (1,)), ((), ())),
                            preferred_element_type=jnp.float32)    # (tm, D_out)
    o_ref[...] = o.astype(o_ref.dtype)


def _round_up(a, b):
    return (a + b - 1) // b * b


@functools.partial(jax.jit, static_argnames=("tile_m", "out_dtype"))
def sparse_weight_net_forward(x, w1a, w1b, w2a, w2b, *, tile_m=128,
                              out_dtype=jnp.float32):
    """x: (M, D_in); w1a/w1b: (H, D_in); w2a/w2b: (D_out, H) (PyTorch layout)."""
    M, D_in = x.shape
    H = w1a.shape[0]
    D_out = w2a.shape[0]
    assert w1a.shape == w1b.shape == (H, D_in)
    assert w2a.shape == w2b.shape == (D_out, H)

    # M tiling: pad the batch so every tile is full; pad rows are zero and are
    # sliced off at the end.
    tile_m = max(8, min(tile_m, _round_up(M, 8)))
    padded_m = _round_up(M, tile_m)
    if padded_m != M:
        x = jnp.pad(x, ((0, padded_m - M), (0, 0)))
    grid = (padded_m // tile_m,)

    out_itemsize = jnp.dtype(out_dtype).itemsize
    # VMEM budget derived from the actual buffers + in-kernel temporaries.
    buf_bytes = (
        2 * tile_m * D_in * 4                    # X tile, double-buffered, f32
        + 2 * tile_m * D_out * out_itemsize      # out tile, double-buffered
        + 2 * H * D_in * 4                       # w1a + w1b, single-buffered, f32
        + 2 * D_out * H * 4                      # w2a + w2b, single-buffered, f32
        + (H * D_in + D_out * H) * 2             # bf16 W_eff temporaries
        + tile_m * D_in * 2                      # bf16 X copy
        + tile_m * H * (4 + 2)                   # f32 hidden + bf16 hidden staging
    )
    # 2x + headroom for spills / compiler scratch; floor covers v5e's 16 MiB
    # default scoped limit, ceiling stays under v7x's 64 MiB physical VMEM.
    vmem_limit = int(min(max(2 * buf_bytes + (8 << 20), 32 << 20), 56 << 20))

    flops = (2 * padded_m * (D_in * H + H * D_out)
             + grid[0] * (H * D_in + D_out * H))          # matmuls + per-step W_eff
    bytes_accessed = (padded_m * D_in * 4
                      + 2 * (H * D_in + D_out * H) * 4
                      + padded_m * D_out * out_itemsize)

    def weight_spec(shape):
        # Grid-invariant (resident) block: DMA'd once, single-buffered.
        return pl.BlockSpec(shape, lambda i: (0, 0), pipeline_mode=pl.Buffered(1))

    out = pl.pallas_call(
        _sparse_mlp_kernel,
        out_shape=jax.ShapeDtypeStruct((padded_m, D_out), out_dtype),
        grid_spec=pltpu.PrefetchScalarGridSpec(
            num_scalar_prefetch=0,
            grid=grid,
            in_specs=[
                pl.BlockSpec((tile_m, D_in), lambda i: (i, 0)),   # streamed X tile
                weight_spec((H, D_in)),                           # weight1
                weight_spec((H, D_in)),                           # weight1_2
                weight_spec((D_out, H)),                          # weight2
                weight_spec((D_out, H)),                          # weight2_2
            ],
            out_specs=pl.BlockSpec((tile_m, D_out), lambda i: (i, 0)),
        ),
        compiler_params=pltpu.CompilerParams(
            dimension_semantics=("parallel",),
            vmem_limit_bytes=vmem_limit,
        ),
        cost_estimate=pl.CostEstimate(
            flops=flops, transcendentals=0, bytes_accessed=bytes_accessed),
    )(x, w1a, w1b, w2a, w2b)

    return out[:M] if padded_m != M else out


def init_params(key, input_dim, hidden_dim, output_dim, dtype=jnp.float32):
    """Mimics kaiming_uniform_(a=sqrt(5)) -> U(-1/sqrt(fan_in), 1/sqrt(fan_in))."""
    k1, k2, k3, k4 = jax.random.split(key, 4)
    b1 = 1.0 / math.sqrt(input_dim)
    b2 = 1.0 / math.sqrt(hidden_dim)
    w1a = jax.random.uniform(k1, (hidden_dim, input_dim), dtype, -b1, b1)
    w1b = jax.random.uniform(k2, (hidden_dim, input_dim), dtype, -b1, b1)
    w2a = jax.random.uniform(k3, (output_dim, hidden_dim), dtype, -b2, b2)
    w2b = jax.random.uniform(k4, (output_dim, hidden_dim), dtype, -b2, b2)
    return w1a, w1b, w2a, w2b


if __name__ == "__main__":
    # Small shapes consistent with the module (hidden_dim shrunk from 4096 for
    # the demo).  H=256 / D_out=128 keep tiles MXU- and lane-aligned; batch=256
    # gives two "parallel" grid steps so a megacore chip feeds both TCs.
    batch, input_dim, hidden_dim, output_dim = 256, 128, 256, 128

    key = jax.random.PRNGKey(0)
    kx, kp = jax.random.split(key)
    x = jax.random.normal(kx, (batch, input_dim), jnp.float32)
    w1a, w1b, w2a, w2b = init_params(kp, input_dim, hidden_dim, output_dim)

    out = jax.block_until_ready(sparse_weight_net_forward(x, w1a, w1b, w2a, w2b))

    # Reference applying the same bf16 rounding / f32 accumulation.
    w1e = (w1a * w1b).astype(jnp.bfloat16).astype(jnp.float32)
    w2e = (w2a * w2b).astype(jnp.bfloat16).astype(jnp.float32)
    xb = x.astype(jnp.bfloat16).astype(jnp.float32)
    h = jnp.maximum(xb @ w1e.T, 0.0).astype(jnp.bfloat16).astype(jnp.float32)
    ref = h @ w2e.T

    assert out.shape == (batch, output_dim)
    assert not bool(jnp.isnan(out).any())   # mirrors SpaRedLinear's in-forward NaN assert
    rel_err = float(jnp.max(jnp.abs(out - ref)) / (jnp.max(jnp.abs(ref)) + 1e-12))
    assert rel_err < 1e-2, f"max relative error too large: {rel_err}"

    print("KERNEL_OK")
</pallas_src>

<mosaic_0001>
module attributes {stable_mosaic.version = 11 : i64} {
  func.func @_sparse_mlp_kernel(%arg0: i32, %arg1: memref<128x128xf32, #tpu.memory_space<vmem>>, %arg2: memref<256x128xf32, #tpu.memory_space<vmem>>, %arg3: memref<256x128xf32, #tpu.memory_space<vmem>>, %arg4: memref<128x256xf32, #tpu.memory_space<vmem>>, %arg5: memref<128x256xf32, #tpu.memory_space<vmem>>, %arg6: memref<128x128xf32, #tpu.memory_space<vmem>>) attributes {dimension_semantics = [#tpu.dimension_semantics<parallel>], iteration_bounds = array<i64: 2>, scalar_prefetch = 0 : i64, scratch_operands = 0 : i64, tpu.core_type = #tpu.core_type<tc>, window_params = [{transform_indices = @transform_0, window_bounds = array<i64: 128, 128>}, {pipeline_mode = #tpu.pipeline_mode<synchronous>, transform_indices = @transform_1, window_bounds = array<i64: 256, 128>}, {pipeline_mode = #tpu.pipeline_mode<synchronous>, transform_indices = @transform_2, window_bounds = array<i64: 256, 128>}, {pipeline_mode = #tpu.pipeline_mode<synchronous>, transform_indices = @transform_3, window_bounds = array<i64: 128, 256>}, {pipeline_mode = #tpu.pipeline_mode<synchronous>, transform_indices = @transform_4, window_bounds = array<i64: 128, 256>}, {transform_indices = @transform_5, window_bounds = array<i64: 128, 128>}]} {
    %c0 = arith.constant 0 : index
    %c0_0 = arith.constant 0 : index
    %0 = vector.load %arg2[%c0, %c0_0] : memref<256x128xf32, #tpu.memory_space<vmem>>, vector<256x128xf32>
    %c0_1 = arith.constant 0 : index
    %c0_2 = arith.constant 0 : index
    %1 = vector.load %arg3[%c0_1, %c0_2] : memref<256x128xf32, #tpu.memory_space<vmem>>, vector<256x128xf32>
    %2 = arith.mulf %0, %1 : vector<256x128xf32>
    %3 = arith.truncf %2 : vector<256x128xf32> to vector<256x128xbf16>
    %c0_3 = arith.constant 0 : index
    %c0_4 = arith.constant 0 : index
    %4 = vector.load %arg4[%c0_3, %c0_4] : memref<128x256xf32, #tpu.memory_space<vmem>>, vector<128x256xf32>
    %c0_5 = arith.constant 0 : index
    %c0_6 = arith.constant 0 : index
    %5 = vector.load %arg5[%c0_5, %c0_6] : memref<128x256xf32, #tpu.memory_space<vmem>>, vector<128x256xf32>
    %6 = arith.mulf %4, %5 : vector<128x256xf32>
    %7 = arith.truncf %6 : vector<128x256xf32> to vector<128x256xbf16>
    %c0_7 = arith.constant 0 : index
    %c0_8 = arith.constant 0 : index
    %8 = vector.load %arg1[%c0_7, %c0_8] : memref<128x128xf32, #tpu.memory_space<vmem>>, vector<128x128xf32>
    %9 = arith.truncf %8 : vector<128x128xf32> to vector<128x128xbf16>
    %cst = arith.constant dense<0.000000e+00> : vector<128x256xf32>
    %10 = tpu.matmul %9, %3, %cst {dimension_numbers = #tpu.dot_dimension_numbers<[1], [1], [0], [0], [0, 0, 1, 0], [], []>} : vector<128x128xbf16>, vector<256x128xbf16>, vector<128x256xf32> -> vector<128x256xf32>
    %cst_9 = arith.constant 0.000000e+00 : f32
    %11 = vector.broadcast %cst_9 : f32 to vector<128x256xf32>
    %12 = arith.maximumf %10, %11 : vector<128x256xf32>
    %13 = arith.truncf %12 : vector<128x256xf32> to vector<128x256xbf16>
    %cst_10 = arith.constant dense<0.000000e+00> : vector<128x128xf32>
    %14 = tpu.matmul %13, %7, %cst_10 {dimension_numbers = #tpu.dot_dimension_numbers<[1], [1], [0], [0], [0, 0, 1, 0], [], []>} : vector<128x256xbf16>, vector<128x256xbf16>, vector<128x128xf32> -> vector<128x128xf32>
    %c0_11 = arith.constant 0 : index
    %c0_12 = arith.constant 0 : index
    %15 = vector.load %arg6[%c0_11, %c0_12] : memref<128x128xf32, #tpu.memory_space<vmem>>, vector<128x128xf32>
    tpu.vector_store %arg6[%c0_11, %c0_12], %14 {strides = array<i32>} : memref<128x128xf32, #tpu.memory_space<vmem>>, vector<128x128xf32>,
    return
  }
  func.func @transform_0(%arg0: i32) -> (i32, i32) {
    %c0_i32 = arith.constant 0 : i32
    %c0_i32_0 = arith.constant 0 : i32
    return %arg0, %c0_i32 : i32, i32
  }
  func.func @transform_1(%arg0: i32) -> (i32, i32) {
    %c0_i32 = arith.constant 0 : i32
    %c0_i32_0 = arith.constant 0 : i32
    %c0_i32_1 = arith.constant 0 : i32
    return %c0_i32, %c0_i32_0 : i32, i32
  }
  func.func @transform_2(%arg0: i32) -> (i32, i32) {
    %c0_i32 = arith.constant 0 : i32
    %c0_i32_0 = arith.constant 0 : i32
    %c0_i32_1 = arith.constant 0 : i32
    return %c0_i32, %c0_i32_0 : i32, i32
  }
  func.func @transform_3(%arg0: i32) -> (i32, i32) {
    %c0_i32 = arith.constant 0 : i32
    %c0_i32_0 = arith.constant 0 : i32
    %c0_i32_1 = arith.constant 0 : i32
    return %c0_i32, %c0_i32_0 : i32, i32
  }
  func.func @transform_4(%arg0: i32) -> (i32, i32) {
    %c0_i32 = arith.constant 0 : i32
    %c0_i32_0 = arith.constant 0 : i32
    %c0_i32_1 = arith.constant 0 : i32
    return %c0_i32, %c0_i32_0 : i32, i32
  }
  func.func @transform_5(%arg0: i32) -> (i32, i32) {
    %c0_i32 = arith.constant 0 : i32
    %c0_i32_0 = arith.constant 0 : i32
    return %arg0, %c0_i32 : i32, i32
  }
}

</mosaic_0001>

<bundles_post_ra>
// kernel: sparse_weight_net_forward.1
= control target key start
LH: loop header
LB: loop body
LE: loop exit
PB: predicated region body
PF: predicated region fallthrough
CT: control target
= control target key end

     0   :  { %10 = vsyncpa [#allocation3], 0  ;;  %s1544_s0 = inlined_call_operand.hbm [shape: f32[256,128], index: 0, kind: input, shape index: {}]   ;;  %s1545_s1 = inlined_call_operand.hbm [shape: f32[256,128], index: 1, kind: input, shape index: {}]   ;;  %s1546_s2 = inlined_call_operand.hbm [shape: f32[256,128], index: 2, kind: input, shape index: {}]   ;;  %s1547_s3 = inlined_call_operand.hbm [shape: f32[128,256], index: 3, kind: input, shape index: {}]   ;;  %s1548_s4 = inlined_call_operand.hbm [shape: f32[128,256], index: 4, kind: input, shape index: {}]   ;;  %s1549_s5 = inlined_call_operand.hbm [shape: f32[256,128], index: 5, kind: output, shape index: {}]  }
   0x1   :  { %12 = vsyncpa [#allocation3 + $0x1], 0 }
   0x2   :  { %13 = vsyncpa [#allocation6], 0 }
   0x3   :  { %14 = vsyncpa [#allocation9], 0 }
   0x4   :  { %15 = vsyncpa [#allocation4], 0 }
   0x5   :  { %17 = vsyncpa [#allocation4 + $0x1], 0  ;;  %s1331_s18 = smov 0   ;;  %s1333_s19 = smov 0  }
   0x6   :  { %s1335_s20 = smov 0   ;;  %s1337_s21 = smov 0  }
   0x7 LB: > { %s1352_s22 = sadd.s32 4294967295, %s1289_s21   ;;  %s948_s23 = sadd.s32 4294967294, %s1289_s21   ;;  %s1289_s21 = sphi %s1337_s21, %s1562_s21   ;;  %s1285_s20 = sphi %s1335_s20, %s1561_s20   ;;  %s1281_s19 = sphi %s1333_s19, %s1560_s19   ;;  %s1277_s18 = sphi %s1331_s18, %s1559_s18  }
   0x8   : > { %p43_p0 = scmp.ne.s32.totalorder %s1281_s19, %s1277_s18  ;;  %p44_p1 = scmp.eq.s32.totalorder %s1352_s22, 0 }
   0x9   : > { %p151_p2 = scmp.eq.s32.totalorder %s1352_s22, 1  ;;  %p157_p3 = scmp.eq.s32.totalorder %s948_s23, 1 }
   0xa   : > { %p1361_p4 = por %p44_p1, %p43_p0  ;;  %p949_p5 = scmp.ge.s32.totalorder %s1289_s21, 1 }
   0xb   : > { %p1366_p6 = por %p157_p3, %p43_p0  ;;  %p164_p7 = scmp.lt.s32.totalorder %s1289_s21, 3 }
   0xc   : > { %s175_s28 = sshll.u32 %s1545_s1, 4  ;;  %s1291_s30 = smov [#allocation5]   ;;  %s176_s28 = int_to_ptr.hbm [resolvable:$true] %s175_s28 }
   0xd   : > { %p1374_p8 = pnand %p949_p5, %p164_p7  ;;  %s177_s6 = sshll.u32 %s1291_s30, 4  ;;  %s178_s6 = int_to_ptr.vmem [resolvable:$true] %s177_s6 }
   0xe   : > { %s203_s10 = sshll.u32 %s1547_s3, 4  ;;  %s1550_s11 = smov 128   ;;  %s204_s10 = int_to_ptr.hbm [resolvable:$true] %s203_s10 }
   0xf   : > { %p992_p9 = pneg %p1374_p8  ;;  %s1293_s12 = smov 8  }
  0x10   : > { %s1294_s13 = smov [#allocation8]   ;;  %s1295_s15 = smov 256  }
  0x11   : > { %p1382_p10 = pnand %p992_p9, %p44_p1  ;;  %s205_s14 = sshll.u32 %s1294_s13, 4  ;;  %s206_s14 = int_to_ptr.vmem [resolvable:$true] %s205_s14 }
  0x12   : > { %s1296_s16 = smov 16   ;;  %s189_s26 = sshll.u32 %s1546_s2, 4  ;;  %s190_s26 = int_to_ptr.hbm [resolvable:$true] %s189_s26 }
  0x13   : > { %995 = dma.hbm_to_vmem [thread:$0]  (!%p1382_p10), %s176_s28, 4096, %s178_s6, [#allocation6], %s1550_s11, %s1550_s11, %s1293_s12  }
  0x14   : > { %1001 = dma.hbm_to_vmem [thread:$0]  (!%p1382_p10), %s204_s10, 4096, %s206_s14, [#allocation9], %s1295_s15, %s1295_s15, %s1296_s16  }
  0x15   : > { %s1297_s27 = smov [#allocation7]   ;;  %s217_s8 = sshll.u32 %s1548_s4, 4  ;;  %s218_s8 = int_to_ptr.hbm [resolvable:$true] %s217_s8 }
  0x16   : > { %s191_s28 = sshll.u32 %s1297_s27, 4  ;;  %s1298_s9 = smov [#allocation10]   ;;  %s192_s28 = int_to_ptr.vmem [resolvable:$true] %s191_s28 }
  0x17   : > { %998 = dma.hbm_to_vmem [thread:$0]  (!%p1382_p10), %s190_s26, 4096, %s192_s28, [#allocation6], %s1550_s11, %s1550_s11, %s1293_s12  }
  0x18   : > { %s219_s10 = sshll.u32 %s1298_s9, 4  ;;  %s1411_s13 = sadd.s32 1, %s1289_s21   ;;  %s220_s10 = int_to_ptr.vmem [resolvable:$true] %s219_s10 }
  0x19   : > { %1004 = dma.hbm_to_vmem [thread:$0]  (!%p1382_p10), %s218_s8, 4096, %s220_s10, [#allocation9], %s1295_s15, %s1295_s15, %s1296_s16  }
  0x1a   : > { %s30_s14 = sadd.s32 1, %s1285_s20  ;;  %s27_s17 = ssub.s32 %s1289_s21, %s1411_s13 }
  0x1b   : > { %p37_p12 = scmp.ne.s32.totalorder %s1285_s20, %s1281_s19  ;;  %p28_p13 = scmp.eq.s32.totalorder %s27_s17, 0 }
  0x1c   : > { %p38_p0 = scmp.eq.s32.totalorder %s1289_s21, 0  ;;  %p1017_p5 = scmp.lt.s32.totalorder %s1289_s21, 2 }
  0x1d   : > { %p1421_p3 = por %p151_p2, %p37_p12  ;;  %s233_s27 = sand.u32 1, %s1285_s20  }
  0x1e   : > { %s1427_s26 = scalar_select %p28_p13, %s1285_s20, %s30_s14  }
  0x1f   : > { %p39_p7 = por %p38_p0, %p37_p12  ;;  %s955_s7 = sshll.u32 %s233_s27, 7 }
  0x20   : > { %s970_s15 = sshll.u32 %s1289_s21, 7  ;;  %s237_s6 = scalar_lea.vmem [#allocation2], %s955_s7 }
  0x21   : > { %s242_s30 = scalar_lea.hbm %s1544_s0, %s970_s15  ;;  %s245_s8 = sshll.u32 %s237_s6, 4  ;;  %s246_s8 = int_to_ptr.vmem [resolvable:$true] %s245_s8 }
  0x22   : > { %s243_s9 = sshll.u32 %s242_s30, 4  ;;  %p1434_p2 = pnand %p1017_p5, %p39_p7  ;;  %s244_s9 = int_to_ptr.hbm [resolvable:$true] %s243_s9 }
  0x23   : > { %s234_s14 = scalar_lea.sflag [#allocation3], %s233_s27  ;;  %s1185_s17 = sshra.s32 %s244_s9, 4  ;;  %s1186_s17 = int_to_ptr.hbm [resolvable:$true] %s1185_s17 }
  0x24   : > { %s1187_s11 = scalar_lea.hbm %s1186_s17, 128  ;;  %p1189_p10 = pneg %p1434_p2 }
  0x25   : > { %p1188_p9 = scmp.ne.s32.totalorder %s1186_s17, %s1187_s11  ;;  %s1192_s16 = scalar_lea.hbm %s1544_s0, 256 }
  0x26   : > { %p1193_p0 = scmp.lt.s32.totalorder %s1186_s17, %s1544_s0  ;;  %p1194_p5 = scmp.lt.s32.totalorder %s1192_s16, %s1187_s11 }
  0x27   : > { %p1190_p12 = pnand %p1189_p10, %p1188_p9 }
  0x28   : > { %p1195_p7 = por %p1194_p5, %p1193_p0 }
  0x29   : > { %p1191_p13 = pneg %p1190_p12 }
  0x2b   : > { %p1196_p11 = pnand %p1195_p7, %p1191_p13 }
  0x2d   : > { %1199 = shalt.err (!%p1196_p11)
}
  0x2e   : > { %s1557_s27 = smov 128   ;;  %257 = sbr.rel (%p1374_p8) target bundleno = 523 (0x20b), region = 40 }
  0x2f   : > { %1008 = dma.hbm_to_vmem [thread:$0]  (!%p1434_p2), %s244_s9, 2048, %s246_s8, %s234_s14, %s1557_s27, %s1557_s27, %s1293_s12  }
  0x30   : > { %s1454_s6 = sand.u32 (!%p1374_p8), 1, %s1281_s19  }
  0x31   : > { %s959_s11 = sshll.u32 (!%p1374_p8), %s1454_s6, 7  ;;  %s260_s17 = scalar_lea.sflag (!%p1374_p8), [#allocation3], %s1454_s6 }
  0x32   : > { %s1460_s15 = scalar_lea.vmem (!%p1374_p8), [#allocation2], %s959_s11 }
  0x33   : > { %1260 = dma.done.wait (%p1361_p4), %s260_s17, 2048  }
  0x34   : > { %1262 = vsyncadd (%p1361_p4), %s260_s17, 4294965248 }
  0x35   : > { %1264 = dma.done.wait (%p44_p1), [#allocation6], 8192  }
  0x36   : > { %1266 = vsyncadd (%p44_p1), [#allocation6], 4294959104 }
  0x37   : > { %1268 = dma.done.wait (%p44_p1), [#allocation9], 8192  }
  0x38   : > { %1270 = vsyncadd (%p44_p1), [#allocation9], 4294959104  ;;  %v327_v0 = vld [vmem:[#allocation5 + $0x70] sm:$0xff]  ;;  %v328_v1 = vld [vmem:[#allocation5 + $0x78] sm:$0xff]  ;;  %s1492_s24 = scalar_lea.vmem [#allocation11], %s959_s11  ;;  %s971_s29 = sshll.u32 %s1352_s22, 7 }
  0x39   : > { %v359_v2 = vld [vmem:[#allocation7 + $0x70] sm:$0xff]  ;;  %v360_v3 = vld [vmem:[#allocation7 + $0x78] sm:$0xff]  ;;  %v325_v10 = vld [vmem:[#allocation5 + $0x60] sm:$0xff]  ;;  %s833_s9 = scalar_lea.hbm %s1549_s5, %s971_s29  ;;  %s834_s10 = sshll.u32 %s1492_s24, 4  ;;  %s835_s10 = int_to_ptr.vmem [resolvable:$true] %s834_s10 }
  0x3a   : > { %v391_v4 = vmul.f32 %v359_v2, %v327_v0  ;;  %v343_v5 = vld [vmem:[#allocation5 + $0xf0] sm:$0xff]  ;;  %v344_v6 = vld [vmem:[#allocation5 + $0xf8] sm:$0xff]  ;;  %v392_v7 = vmul.f32 %v360_v3, %v328_v1  ;;  %v326_v13 = vld [vmem:[#allocation5 + $0x68] sm:$0xff]  ;;  %s836_s14 = sshll.u32 %s833_s9, 4  ;;  %s822_s7 = scalar_lea.sflag [#allocation4], %s1454_s6  ;;  %s837_s14 = int_to_ptr.hbm [resolvable:$true] %s836_s14 }
  0x3b   : > { %v375_v8 = vld [vmem:[#allocation7 + $0xf0] sm:$0xff]  ;;  %v376_v9 = vld [vmem:[#allocation7 + $0xf8] sm:$0xff]  ;;  %v357_v14 = vld [vmem:[#allocation7 + $0x60] sm:$0xff]  ;;  %s1229_s16 = sshra.s32 %s837_s14, 4  ;;  %s1235_s27 = scalar_lea.hbm %s1549_s5, 256  ;;  %s1230_s16 = int_to_ptr.hbm [resolvable:$true] %s1229_s16 }
  0x3c   : > { %v407_v11 = vmul.f32 %v375_v8, %v343_v5  ;;  %v408_v12 = vmul.f32 %v376_v9, %v344_v6  ;;  %v358_v15 = vld [vmem:[#allocation7 + $0x68] sm:$0xff]  ;;  %v416_v16 = vpack.c.bf16 %v392_v7, %v391_v4  ;;  %v341_v17 = vld [vmem:[#allocation5 + $0xe0] sm:$0xff]  ;;  %v389_v22 = vmul.f32 %v357_v14, %v325_v10  ;;  %v323_v27 = vld [vmem:[#allocation5 + $0x50] sm:$0xff]  ;;  %s1231_s22 = scalar_lea.hbm %s1230_s16, 128  ;;  %p1236_p11 = scmp.lt.s32.totalorder %s1230_s16, %s1549_s5 }
  0x3d   : > { %v342_v18 = vld [vmem:[#allocation5 + $0xe8] sm:$0xff]  ;;  %v373_v19 = vld [vmem:[#allocation7 + $0xe0] sm:$0xff]  ;;  %v390_v23 = vmul.f32 %v358_v15, %v326_v13  ;;  %v324_v28 = vld [vmem:[#allocation5 + $0x58] sm:$0xff]  ;;  %p1232_p1 = scmp.ne.s32.totalorder %s1230_s16, %s1231_s22  ;;  %p1237_p2 = scmp.lt.s32.totalorder %s1235_s27, %s1231_s22 }
  0x3e   : > { %v424_v20 = vpack.c.bf16 %v408_v12, %v407_v11  ;;  %v374_v21 = vld [vmem:[#allocation7 + $0xe8] sm:$0xff]  ;;  %561 = vmatpush.bf16.xpose.msra.mxu0 %v416_v16  ;;  %v405_v24 = vmul.f32 %v373_v19, %v341_v17  ;;  %v355_v30 = vld [vmem:[#allocation7 + $0x50] sm:$0xff]  ;;  %v356_v31 = vld [vmem:[#allocation7 + $0x58] sm:$0xff] }
  0x3f   : > { %v406_v25 = vmul.f32 %v374_v21, %v342_v18  ;;  %v415_v26 = vpack.c.bf16 %v390_v23, %v389_v22  ;;  %v339_v32 = vld [vmem:[#allocation5 + $0xd0] sm:$0xff]  ;;  %v340_v33 = vld [vmem:[#allocation5 + $0xd8] sm:$0xff]  ;;  %v387_v36 = vmul.f32 %v355_v30, %v323_v27  ;;  %v388_v37 = vmul.f32 %v356_v31, %v324_v28  ;;  %v321_v41 = vld [vmem:[#allocation5 + $0x40] sm:$0xff]  ;;  %p1233_p4 = pnand %p1232_p1, %p1421_p3  ;;  %p1238_p9 = por %p1237_p2, %p1236_p11 }
  0x40   : > { %610 = vmatpush.bf16.xpose.msra.mxu1 %v424_v20  ;;  %v371_v34 = vld [vmem:[#allocation7 + $0xd0] sm:$0xff]  ;;  %v372_v35 = vld [vmem:[#allocation7 + $0xd8] sm:$0xff]  ;;  %v322_v42 = vld [vmem:[#allocation5 + $0x48] sm:$0xff] }
  0x41   : > { %v423_v29 = vpack.c.bf16 %v406_v25, %v405_v24  ;;  %v403_v38 = vmul.f32 %v371_v34, %v339_v32  ;;  %v404_v39 = vmul.f32 %v372_v35, %v340_v33  ;;  %v414_v40 = vpack.c.bf16 %v388_v37, %v387_v36  ;;  %v353_v44 = vld [vmem:[#allocation7 + $0x40] sm:$0xff]  ;;  %v354_v45 = vld [vmem:[#allocation7 + $0x48] sm:$0xff]  ;;  %v319_v55 = vld [vmem:[#allocation5 + $0x30] sm:$0xff]  ;;  %p1234_p8 = pneg %p1233_p4 }
  0x42   : > { %v337_v46 = vld [vmem:[#allocation5 + $0xc0] sm:$0xff]  ;;  %v338_v47 = vld [vmem:[#allocation5 + $0xc8] sm:$0xff]  ;;  %v385_v50 = vmul.f32 %v353_v44, %v321_v41  ;;  %v386_v51 = vmul.f32 %v354_v45, %v322_v42  ;;  %v320_v56 = vld [vmem:[#allocation5 + $0x38] sm:$0xff] }
  0x43   : > { %v422_v43 = vpack.c.bf16 %v404_v39, %v403_v38  ;;  %v369_v48 = vld [vmem:[#allocation7 + $0xc0] sm:$0xff]  ;;  %v370_v49 = vld [vmem:[#allocation7 + $0xc8] sm:$0xff]  ;;  %v351_v58 = vld [vmem:[#allocation7 + $0x30] sm:$0xff]  ;;  %p1239_p10 = pnand %p1238_p9, %p1234_p8 }
  0x44   : > { %v401_v52 = vmul.f32 %v369_v48, %v337_v46  ;;  %v402_v53 = vmul.f32 %v370_v49, %v338_v47  ;;  %v413_v54 = vpack.c.bf16 %v386_v51, %v385_v50  ;;  %v352_v59 = vld [vmem:[#allocation7 + $0x38] sm:$0xff]  ;;  %v335_v60 = vld [vmem:[#allocation5 + $0xb0] sm:$0xff]  ;;  %v383_v0 = vmul.f32 %v351_v58, %v319_v55  ;;  %v317_v5 = vld [vmem:[#allocation5 + $0x20] sm:$0xff] }
  0x45   : > { %v336_v61 = vld [vmem:[#allocation5 + $0xb8] sm:$0xff]  ;;  %v367_v62 = vld [vmem:[#allocation7 + $0xb0] sm:$0xff]  ;;  %v384_v1 = vmul.f32 %v352_v59, %v320_v56  ;;  %v318_v6 = vld [vmem:[#allocation5 + $0x28] sm:$0xff] }
  0x46   : > { %562 = vmatpush.bf16.xpose.msra.mxu0 %v415_v26  ;;  %v421_v57 = vpack.c.bf16 %v402_v53, %v401_v52  ;;  %v368_v63 = vld [vmem:[#allocation7 + $0xb8] sm:$0xff]  ;;  %v399_v2 = vmul.f32 %v367_v62, %v335_v60  ;;  %v349_v8 = vld [vmem:[#allocation7 + $0x20] sm:$0xff]  ;;  %v350_v9 = vld [vmem:[#allocation7 + $0x28] sm:$0xff] }
  0x47   : > { %v400_v3 = vmul.f32 %v368_v63, %v336_v61  ;;  %v412_v4 = vpack.c.bf16 %v384_v1, %v383_v0  ;;  %v333_v10 = vld [vmem:[#allocation5 + $0xa0] sm:$0xff]  ;;  %v334_v11 = vld [vmem:[#allocation5 + $0xa8] sm:$0xff]  ;;  %v381_v14 = vmul.f32 %v349_v8, %v317_v5  ;;  %v382_v15 = vmul.f32 %v350_v9, %v318_v6  ;;  %v315_v19 = vld [vmem:[#allocation5 + $0x10] sm:$0xff] }
  0x48   : > { %611 = vmatpush.bf16.xpose.msra.mxu1 %v423_v29  ;;  %v365_v12 = vld [vmem:[#allocation7 + $0xa0] sm:$0xff]  ;;  %v366_v13 = vld [vmem:[#allocation7 + $0xa8] sm:$0xff]  ;;  %v316_v20 = vld [vmem:[#allocation5 + $0x18] sm:$0xff] }
  0x49   : > { %v420_v7 = vpack.c.bf16 %v400_v3, %v399_v2  ;;  %v397_v16 = vmul.f32 %v365_v12, %v333_v10  ;;  %v398_v17 = vmul.f32 %v366_v13, %v334_v11  ;;  %v411_v18 = vpack.c.bf16 %v382_v15, %v381_v14  ;;  %v347_v22 = vld [vmem:[#allocation7 + $0x10] sm:$0xff]  ;;  %v348_v23 = vld [vmem:[#allocation7 + $0x18] sm:$0xff]  ;;  %v313_v33 = vld [vmem:[#allocation5] sm:$0xff] }
  0x4a   : > { %v331_v24 = vld [vmem:[#allocation5 + $0x90] sm:$0xff]  ;;  %v332_v25 = vld [vmem:[#allocation5 + $0x98] sm:$0xff]  ;;  %v379_v28 = vmul.f32 %v347_v22, %v315_v19  ;;  %v380_v29 = vmul.f32 %v348_v23, %v316_v20  ;;  %v314_v34 = vld [vmem:[#allocation5 + $0x8] sm:$0xff] }
  0x4b   : > { %v419_v21 = vpack.c.bf16 %v398_v17, %v397_v16  ;;  %v363_v26 = vld [vmem:[#allocation7 + $0x90] sm:$0xff]  ;;  %v364_v27 = vld [vmem:[#allocation7 + $0x98] sm:$0xff]  ;;  %v345_v36 = vld [vmem:[#allocation7] sm:$0xff] }
  0x4c   : > { %v395_v30 = vmul.f32 %v363_v26, %v331_v24  ;;  %v396_v31 = vmul.f32 %v364_v27, %v332_v25  ;;  %v410_v32 = vpack.c.bf16 %v380_v29, %v379_v28  ;;  %v346_v37 = vld [vmem:[#allocation7 + $0x8] sm:$0xff]  ;;  %v329_v38 = vld [vmem:[#allocation5 + $0x80] sm:$0xff]  ;;  %v377_v42 = vmul.f32 %v345_v36, %v313_v33  ;;  %v539_v51 = vld [vmem:[%s1460_s15 + $0x10] sm:$0xff] }
  0x4d   : > { %v330_v39 = vld [vmem:[#allocation5 + $0x88] sm:$0xff]  ;;  %v537_v48 = vld [vmem:[%s1460_s15] sm:$0xff]  ;;  %v540_v52 = vld [vmem:[%s1460_s15 + $0x18] sm:$0xff] }
  0x4e   : > { %563 = vmatpush.bf16.xpose.msra.mxu0 %v414_v40  ;;  %v418_v35 = vpack.c.bf16 %v396_v31, %v395_v30  ;;  %v361_v40 = vld [vmem:[#allocation7 + $0x80] sm:$0xff]  ;;  %v362_v41 = vld [vmem:[#allocation7 + $0x88] sm:$0xff]  ;;  %v554_v53 = vpack.c.bf16 %v540_v52, %v539_v51  ;;  %v455_v58 = vld [vmem:[#allocation8 + $0xf0] sm:$0xff] }
  0x4f   : > { %v393_v44 = vmul.f32 %v361_v40, %v329_v38  ;;  %v394_v45 = vmul.f32 %v362_v41, %v330_v39  ;;  %v538_v49 = vld [vmem:[%s1460_s15 + $0x8] sm:$0xff]  ;;  %v485_v59 = vld [vmem:[#allocation10 + $0xe0] sm:$0xff]  ;;  %v487_v60 = vld [vmem:[#allocation10 + $0xf0] sm:$0xff] }
  0x50   : > { %612 = vmatpush.bf16.xpose.msra.mxu1 %v422_v43  ;;  %v378_v43 = vmul.f32 %v346_v37, %v314_v34  ;;  %v553_v50 = vpack.c.bf16 %v538_v49, %v537_v48  ;;  %v542_v55 = vld [vmem:[%s1460_s15 + $0x28] sm:$0xff]  ;;  %v456_v63 = vld [vmem:[#allocation8 + $0xf8] sm:$0xff]  ;;  %v519_v0 = vmul.f32 %v487_v60, %v455_v58  ;;  %v449_v10 = vld [vmem:[#allocation8 + $0xc0] sm:$0xff] }
  0x51   : > { %v417_v47 = vpack.c.bf16 %v394_v45, %v393_v44  ;;  %v454_v62 = vld [vmem:[#allocation8 + $0xe8] sm:$0xff]  ;;  %v488_v2 = vld [vmem:[#allocation10 + $0xf8] sm:$0xff]  ;;  %v451_v11 = vld [vmem:[#allocation8 + $0xd0] sm:$0xff] }
  0x52   : > { %v409_v46 = vpack.c.bf16 %v378_v43, %v377_v42  ;;  %v486_v1 = vld [vmem:[#allocation10 + $0xe8] sm:$0xff]  ;;  %v544_v8 = vld [vmem:[%s1460_s15 + $0x38] sm:$0xff]  ;;  %v481_v12 = vld [vmem:[#allocation10 + $0xc0] sm:$0xff] }
  0x53   : > { %v518_v3 = vmul.f32 %v486_v1, %v454_v62  ;;  %v483_v13 = vld [vmem:[#allocation10 + $0xd0] sm:$0xff]  ;;  %v513_v14 = vmul.f32 %v481_v12, %v449_v10  ;;  %v450_v15 = vld [vmem:[#allocation8 + $0xc8] sm:$0xff]  ;;  %v452_v16 = vld [vmem:[#allocation8 + $0xd8] sm:$0xff] }
  0x54   : > { %v515_v17 = vmul.f32 %v483_v13, %v451_v11  ;;  %v484_v19 = vld [vmem:[#allocation10 + $0xd8] sm:$0xff]  ;;  %v445_v20 = vld [vmem:[#allocation8 + $0xa0] sm:$0xff]  ;;  %v447_v23 = vld [vmem:[#allocation8 + $0xb0] sm:$0xff] }
  0x55   : > { %v516_v22 = vmul.f32 %v484_v19, %v452_v16  ;;  %v477_v24 = vld [vmem:[#allocation10 + $0xa0] sm:$0xff]  ;;  %v479_v25 = vld [vmem:[#allocation10 + $0xb0] sm:$0xff]  ;;  %v446_v27 = vld [vmem:[#allocation8 + $0xa8] sm:$0xff] }
  0x56   : > { %564 = vmatpush.bf16.xpose.msra.mxu0 %v413_v54  ;;  %v541_v54 = vld [vmem:[%s1460_s15 + $0x20] sm:$0xff]  ;;  %v533_v26 = vpack.c.bf16 %v515_v17, %v513_v14  ;;  %v448_v28 = vld [vmem:[#allocation8 + $0xb8] sm:$0xff]  ;;  %v478_v29 = vld [vmem:[#allocation10 + $0xa8] sm:$0xff]  ;;  %v511_v33 = vmul.f32 %v479_v25, %v447_v23 }
  0x57   : > { %v555_v56 = vpack.c.bf16 %v542_v55, %v541_v54  ;;  %v480_v31 = vld [vmem:[#allocation10 + $0xb8] sm:$0xff]  ;;  %v510_v34 = vmul.f32 %v478_v29, %v446_v27  ;;  %v545_v36 = vld [vmem:[%s1460_s15 + $0x40] sm:$0xff]  ;;  %v546_v37 = vld [vmem:[%s1460_s15 + $0x48] sm:$0xff] }
  0x58   : > { %613 = vmatpush.bf16.xpose.msra.mxu1 %v421_v57  ;;  %v453_v57 = vld [vmem:[#allocation8 + $0xe0] sm:$0xff]  ;;  %v557_v40 = vpack.c.bf16 %v546_v37, %v545_v36  ;;  %v443_v42 = vld [vmem:[#allocation8 + $0x90] sm:$0xff]  ;;  %v474_v49 = vld [vmem:[#allocation10 + $0x88] sm:$0xff] }
  0x59   : > { %v517_v61 = vmul.f32 %v485_v59, %v453_v57  ;;  %v441_v41 = vld [vmem:[#allocation8 + $0x80] sm:$0xff]  ;;  %v475_v44 = vld [vmem:[#allocation10 + $0x90] sm:$0xff]  ;;  %v438_v58 = vld [vmem:[#allocation8 + $0x68] sm:$0xff] }
  0x5a   : > { %v473_v43 = vld [vmem:[#allocation10 + $0x80] sm:$0xff]  ;;  %v507_v48 = vmul.f32 %v475_v44, %v443_v42  ;;  %v439_v54 = vld [vmem:[#allocation8 + $0x70] sm:$0xff]  ;;  %v440_v59 = vld [vmem:[#allocation8 + $0x78] sm:$0xff] }
  0x5b   : > { %v535_v5 = vpack.c.bf16 %v519_v0, %v517_v61  ;;  %v505_v45 = vmul.f32 %v473_v43, %v441_v41  ;;  %v437_v51 = vld [vmem:[#allocation8 + $0x60] sm:$0xff]  ;;  %v470_v60 = vld [vmem:[#allocation10 + $0x68] sm:$0xff]  ;;  %v472_v62 = vld [vmem:[#allocation10 + $0x78] sm:$0xff] }
  0x5c   : > { %v469_v55 = vld [vmem:[#allocation10 + $0x60] sm:$0xff]  ;;  %v502_v1 = vmul.f32 %v470_v60, %v438_v58  ;;  %v467_v11 = vld [vmem:[#allocation10 + $0x50] sm:$0xff]  ;;  %v434_v13 = vld [vmem:[#allocation8 + $0x48] sm:$0xff] }
  0x5d   : > { %707 = vmatpush.bf16.xpose.msra.mxu2 %v535_v5  ;;  %v529_v57 = vpack.c.bf16 %v507_v48, %v505_v45  ;;  %v465_v10 = vld [vmem:[#allocation10 + $0x40] sm:$0xff]  ;;  %v436_v14 = vld [vmem:[#allocation8 + $0x58] sm:$0xff]  ;;  %v466_v16 = vld [vmem:[#allocation10 + $0x48] sm:$0xff] }
  0x5e   : > { %565 = vmatpush.bf16.xpose.msra.mxu0 %v412_v4  ;;  %v520_v4 = vmul.f32 %v488_v2, %v456_v63  ;;  %v501_v63 = vmul.f32 %v469_v55, %v437_v51  ;;  %v504_v2 = vmul.f32 %v472_v62, %v440_v59  ;;  %v468_v17 = vld [vmem:[#allocation10 + $0x58] sm:$0xff]  ;;  %v498_v19 = vmul.f32 %v466_v16, %v434_v13  ;;  %v463_v23 = vld [vmem:[#allocation10 + $0x30] sm:$0xff]  ;;  %v430_v25 = vld [vmem:[#allocation8 + $0x28] sm:$0xff] }
  0x5f   : > { %v462_v27 = vld [vmem:[#allocation10 + $0x28] sm:$0xff]  ;;  %v464_v29 = vld [vmem:[#allocation10 + $0x38] sm:$0xff]  ;;  %v457_v41 = vld [vmem:[#allocation10] sm:$0xff] }
  0x60   : > { %614 = vmatpush.bf16.xpose.msra.mxu1 %v420_v7  ;;  %v536_v6 = vpack.c.bf16 %v520_v4, %v518_v3  ;;  %v543_v7 = vld [vmem:[%s1460_s15 + $0x30] sm:$0xff]  ;;  %v548_v4 = vld [vmem:[%s1460_s15 + $0x58] sm:$0xff]  ;;  %v426_v44 = vld [vmem:[#allocation8 + $0x8] sm:$0xff] }
  0x61   : > { %v556_v9 = vpack.c.bf16 %v544_v8, %v543_v7  ;;  %v547_v3 = vld [vmem:[%s1460_s15 + $0x50] sm:$0xff]  ;;  %v433_v8 = vld [vmem:[#allocation8 + $0x40] sm:$0xff]  ;;  %v428_v45 = vld [vmem:[#allocation8 + $0x18] sm:$0xff] }
  0x62   : > { %756 = vmatpush.bf16.xpose.msra.mxu3 %v536_v6  ;;  %v528_v6 = vpack.c.bf16 %v504_v2, %v502_v1  ;;  %v558_v7 = vpack.c.bf16 %v548_v4, %v547_v3  ;;  %v497_v12 = vmul.f32 %v465_v10, %v433_v8  ;;  %v459_v42 = vld [vmem:[#allocation10 + $0x10] sm:$0xff]  ;;  %v460_v48 = vld [vmem:[#allocation10 + $0x18] sm:$0xff] }
  0x65   : > { %708 = vmatpush.bf16.xpose.msra.mxu2 %v533_v26  ;;  %v432_v26 = vld [vmem:[#allocation8 + $0x38] sm:$0xff] }
  0x66   : > { %566 = vmatpush.bf16.xpose.msra.mxu0 %v411_v18  ;;  %v482_v18 = vld [vmem:[#allocation10 + $0xc8] sm:$0xff] }
  0x68   : > { %615 = vmatpush.bf16.xpose.msra.mxu1 %v419_v21  ;;  %v514_v21 = vmul.f32 %v482_v18, %v450_v15  ;;  %v429_v18 = vld [vmem:[#allocation8 + $0x20] sm:$0xff] }
  0x6a   : > { %v534_v30 = vpack.c.bf16 %v516_v22, %v514_v21  ;;  %v431_v21 = vld [vmem:[#allocation8 + $0x30] sm:$0xff]  ;;  %v461_v22 = vld [vmem:[#allocation10 + $0x20] sm:$0xff] }
  0x6c   : > { %757 = vmatpush.bf16.xpose.msra.mxu3 %v534_v30  ;;  %v493_v30 = vmul.f32 %v461_v22, %v429_v18 }
  0x6e   : > { %567 = vmatpush.bf16.xpose.msra.mxu0 %v410_v32  ;;  %v509_v32 = vmul.f32 %v477_v24, %v445_v20  ;;  %v500_v20 = vmul.f32 %v468_v17, %v436_v14 }
  0x70   : > { %616 = vmatpush.bf16.xpose.msra.mxu1 %v418_v35  ;;  %v512_v35 = vmul.f32 %v480_v31, %v448_v28  ;;  %v531_v38 = vpack.c.bf16 %v511_v33, %v509_v32  ;;  %v526_v28 = vpack.c.bf16 %v500_v20, %v498_v19  ;;  %v495_v31 = vmul.f32 %v463_v23, %v431_v21 }
  0x71   : > { %v494_v32 = vmul.f32 %v462_v27, %v430_v25  ;;  %v496_v33 = vmul.f32 %v464_v29, %v432_v26 }
  0x72   : > { %v532_v39 = vpack.c.bf16 %v512_v35, %v510_v34  ;;  %709 = vmatpush.bf16.xpose.msra.mxu2 %v531_v38  ;;  %v549_v34 = vld [vmem:[%s1460_s15 + $0x60] sm:$0xff]  ;;  %v550_v35 = vld [vmem:[%s1460_s15 + $0x68] sm:$0xff]  ;;  %v523_v36 = vpack.c.bf16 %v495_v31, %v493_v30 }
  0x73   : > { %v524_v37 = vpack.c.bf16 %v496_v33, %v494_v32  ;;  %v559_v38 = vpack.c.bf16 %v550_v35, %v549_v34 }
  0x74   : > { %758 = vmatpush.bf16.xpose.msra.mxu3 %v532_v39  ;;  %v425_v39 = vld [vmem:[#allocation8] sm:$0xff] }
  0x75   : > { %v489_v43 = vmul.f32 %v457_v41, %v425_v39 }
  0x76   : > { %568 = vmatpush.bf16.xpose.msra.mxu0 %v409_v46  ;;  %v442_v46 = vld [vmem:[#allocation8 + $0x88] sm:$0xff] }
  0x77   : > { %v506_v52 = vmul.f32 %v474_v49, %v442_v46 }
  0x78   : > { %617 = vmatpush.bf16.xpose.msra.mxu1 %v417_v47  ;;  %v444_v47 = vld [vmem:[#allocation8 + $0x98] sm:$0xff] }
  0x7a   : > { %710 = vmatpush.bf16.xpose.msra.mxu2 %v529_v57 }
  0x7d   : > { %569 = vmatmul.bf16.vlgmr.msra.gmra.mxu0 %v553_v50 }
  0x7f   : > { %618 = vmatmul.bf16.vlgmr.msra.gmra.mxu1 %v553_v50  ;;  %v476_v50 = vld [vmem:[#allocation10 + $0x98] sm:$0xff] }
  0x8d   : > { %574 = vmatmul.bf16.gmra.mxu0 %v554_v53 }
  0x8f   : > { %623 = vmatmul.bf16.gmra.mxu1 %v554_v53  ;;  %v508_v53 = vmul.f32 %v476_v50, %v444_v47  ;;  %v458_v47 = vld [vmem:[#allocation10 + $0x8] sm:$0xff]  ;;  %v492_v50 = vmul.f32 %v460_v48, %v428_v45 }
  0x90   : > { %v490_v49 = vmul.f32 %v458_v47, %v426_v44 }
  0x91   : > { %v530_v61 = vpack.c.bf16 %v508_v53, %v506_v52  ;;  %v551_v53 = vld [vmem:[%s1460_s15 + $0x70] sm:$0xff] }
  0x92   : > { %v522_v52 = vpack.c.bf16 %v492_v50, %v490_v49 }
  0x93   : > { %759 = vmatpush.bf16.xpose.msra.mxu3 %v530_v61 }
  0x9b   : > { %760 = vmatpush.bf16.xpose.msra.mxu3 %v528_v6 }
  0x9d   : > { %579 = vmatmul.bf16.gmra.mxu0 %v555_v56 }
  0x9f   : > { %628 = vmatmul.bf16.gmra.mxu1 %v555_v56  ;;  %v471_v56 = vld [vmem:[#allocation10 + $0x70] sm:$0xff] }
  0xa0   : > { %v503_v0 = vmul.f32 %v471_v56, %v439_v54  ;;  %v552_v54 = vld [vmem:[%s1460_s15 + $0x78] sm:$0xff] }
  0xa1   : > { %v560_v55 = vpack.c.bf16 %v552_v54, %v551_v53 }
  0xa2   : > { %v527_v5 = vpack.c.bf16 %v503_v0, %v501_v63 }
  0xa3   : > { %761 = vmatpush.bf16.xpose.msra.mxu3 %v526_v28 }
  0xa4   : > { %711 = vmatpush.bf16.xpose.msra.mxu2 %v527_v5 }
  0xab   : > { %762 = vmatpush.bf16.xpose.msra.mxu3 %v524_v37 }
  0xad   : > { %584 = vmatmul.bf16.gmra.mxu0 %v556_v9 }
  0xaf   : > { %633 = vmatmul.bf16.gmra.mxu1 %v556_v9  ;;  %v435_v9 = vld [vmem:[#allocation8 + $0x50] sm:$0xff] }
  0xb0   : > { %v499_v15 = vmul.f32 %v467_v11, %v435_v9 }
  0xb2   : > { %v525_v24 = vpack.c.bf16 %v499_v15, %v497_v12 }
  0xb3   : > { %763 = vmatpush.bf16.xpose.msra.mxu3 %v522_v52 }
  0xb4   : > { %712 = vmatpush.bf16.xpose.msra.mxu2 %v525_v24 }
  0xbc   : > { %713 = vmatpush.bf16.xpose.msra.mxu2 %v523_v36 }
  0xbd   : > { %589 = vmatmul.bf16.gmra.mxu0 %v557_v40 }
  0xbf   : > { %638 = vmatmul.bf16.gmra.mxu1 %v557_v40  ;;  %v427_v40 = vld [vmem:[#allocation8 + $0x10] sm:$0xff] }
  0xc0   : > { %v491_v46 = vmul.f32 %v459_v42, %v427_v40 }
  0xc2   : > { %v521_v51 = vpack.c.bf16 %v491_v46, %v489_v43 }
  0xc4   : > { %714 = vmatpush.bf16.xpose.msra.mxu2 %v521_v51 }
  0xcd   : > { %594 = vmatmul.bf16.gmra.mxu0 %v558_v7 }
  0xcf   : > { %643 = vmatmul.bf16.gmra.mxu1 %v558_v7 }
  0xdd   : > { %599 = vmatmul.bf16.gmra.mxu0 %v559_v38 }
  0xdf   : > { %648 = vmatmul.bf16.gmra.mxu1 %v559_v38 }
  0xed   : > { %604 = vmatmul.bf16.gmra.mxu0 %v560_v55 }
  0xef   : > { %653 = vmatmul.bf16.gmra.mxu1 %v560_v55 }
  0xfa   : > { %v570_v56 = vpop.f32.mrf.mxu0 }
  0xfb   : > { %v659_v59 = vmax.f32 %v570_v56, 0.0 }
  0xfc   : > { %v619_v57 = vpop.f32.mrf.mxu1 }
  0xfd   : > { %v660_v62 = vmax.f32 %v619_v57, 0.0 }
 0x102   : > { %v572_v58 = vpop.f32.mrf.mxu0 }
 0x103   : > { %v661_v60 = vmax.f32 %v572_v58, 0.0 }
 0x104   : > { %v621_v61 = vpop.f32.mrf.mxu1 }
 0x105   : > { %v662_v63 = vmax.f32 %v621_v61, 0.0  ;;  %v691_v0 = vpack.c.bf16 %v661_v60, %v659_v59 }
 0x107   : > { %v692_v1 = vpack.c.bf16 %v662_v63, %v660_v62  ;;  %715 = vmatmul.bf16.vlgmr.msra.gmra.mxu2 %v691_v0 }
 0x109   : > { %764 = vmatmul.bf16.vlgmr.msra.gmra.mxu3 %v692_v1 }
 0x10a   : > { %v575_v2 = vpop.f32.mrf.mxu0 }
 0x10b   : > { %v663_v5 = vmax.f32 %v575_v2, 0.0 }
 0x10c   : > { %v624_v3 = vpop.f32.mrf.mxu1 }
 0x10d   : > { %v664_v8 = vmax.f32 %v624_v3, 0.0 }
 0x112   : > { %v577_v4 = vpop.f32.mrf.mxu0 }
 0x113   : > { %v665_v6 = vmax.f32 %v577_v4, 0.0 }
 0x114   : > { %v626_v7 = vpop.f32.mrf.mxu1 }
 0x115   : > { %v666_v9 = vmax.f32 %v626_v7, 0.0  ;;  %v693_v10 = vpack.c.bf16 %v665_v6, %v663_v5 }
 0x117   : > { %v694_v11 = vpack.c.bf16 %v666_v9, %v664_v8  ;;  %720 = vmatmul.bf16.gmra.mxu2 %v693_v10 }
 0x119   : > { %769 = vmatmul.bf16.gmra.mxu3 %v694_v11 }
 0x11a   : > { %v580_v12 = vpop.f32.mrf.mxu0 }
 0x11b   : > { %v667_v15 = vmax.f32 %v580_v12, 0.0 }
 0x11c   : > { %v629_v13 = vpop.f32.mrf.mxu1 }
 0x11d   : > { %v668_v18 = vmax.f32 %v629_v13, 0.0 }
 0x122   : > { %v582_v14 = vpop.f32.mrf.mxu0 }
 0x123   : > { %v669_v16 = vmax.f32 %v582_v14, 0.0 }
 0x124   : > { %v631_v17 = vpop.f32.mrf.mxu1 }
 0x125   : > { %v670_v19 = vmax.f32 %v631_v17, 0.0  ;;  %v695_v20 = vpack.c.bf16 %v669_v16, %v667_v15 }
 0x127   : > { %v696_v21 = vpack.c.bf16 %v670_v19, %v668_v18  ;;  %725 = vmatmul.bf16.gmra.mxu2 %v695_v20 }
 0x129   : > { %774 = vmatmul.bf16.gmra.mxu3 %v696_v21 }
 0x12a   : > { %v585_v22 = vpop.f32.mrf.mxu0 }
 0x12b   : > { %v671_v25 = vmax.f32 %v585_v22, 0.0 }
 0x12c   : > { %v634_v23 = vpop.f32.mrf.mxu1 }
 0x12d   : > { %v672_v28 = vmax.f32 %v634_v23, 0.0 }
 0x132   : > { %v587_v24 = vpop.f32.mrf.mxu0 }
 0x133   : > { %v673_v26 = vmax.f32 %v587_v24, 0.0 }
 0x134   : > { %v636_v27 = vpop.f32.mrf.mxu1 }
 0x135   : > { %v674_v29 = vmax.f32 %v636_v27, 0.0  ;;  %v697_v30 = vpack.c.bf16 %v673_v26, %v671_v25 }
 0x137   : > { %v698_v31 = vpack.c.bf16 %v674_v29, %v672_v28  ;;  %730 = vmatmul.bf16.gmra.mxu2 %v697_v30 }
 0x139   : > { %779 = vmatmul.bf16.gmra.mxu3 %v698_v31 }
 0x13a   : > { %v590_v32 = vpop.f32.mrf.mxu0 }
 0x13b   : > { %v675_v35 = vmax.f32 %v590_v32, 0.0 }
 0x13c   : > { %v639_v33 = vpop.f32.mrf.mxu1 }
 0x13d   : > { %v676_v38 = vmax.f32 %v639_v33, 0.0 }
 0x142   : > { %v592_v34 = vpop.f32.mrf.mxu0 }
 0x143   : > { %v677_v36 = vmax.f32 %v592_v34, 0.0 }
 0x144   : > { %v641_v37 = vpop.f32.mrf.mxu1 }
 0x145   : > { %v678_v39 = vmax.f32 %v641_v37, 0.0  ;;  %v699_v40 = vpack.c.bf16 %v677_v36, %v675_v35 }
 0x147   : > { %v700_v41 = vpack.c.bf16 %v678_v39, %v676_v38  ;;  %735 = vmatmul.bf16.gmra.mxu2 %v699_v40 }
 0x149   : > { %784 = vmatmul.bf16.gmra.mxu3 %v700_v41 }
 0x14a   : > { %v595_v42 = vpop.f32.mrf.mxu0 }
 0x14b   : > { %v679_v45 = vmax.f32 %v595_v42, 0.0 }
 0x14c   : > { %v644_v43 = vpop.f32.mrf.mxu1 }
 0x14d   : > { %v680_v48 = vmax.f32 %v644_v43, 0.0 }
 0x152   : > { %v597_v44 = vpop.f32.mrf.mxu0 }
 0x153   : > { %v681_v46 = vmax.f32 %v597_v44, 0.0 }
 0x154   : > { %v646_v47 = vpop.f32.mrf.mxu1 }
 0x155   : > { %v682_v49 = vmax.f32 %v646_v47, 0.0  ;;  %v701_v50 = vpack.c.bf16 %v681_v46, %v679_v45 }
 0x157   : > { %v702_v51 = vpack.c.bf16 %v682_v49, %v680_v48  ;;  %740 = vmatmul.bf16.gmra.mxu2 %v701_v50 }
 0x159   : > { %789 = vmatmul.bf16.gmra.mxu3 %v702_v51 }
 0x15a   : > { %v600_v52 = vpop.f32.mrf.mxu0 }
 0x15b   : > { %v683_v55 = vmax.f32 %v600_v52, 0.0 }
 0x15c   : > { %v649_v53 = vpop.f32.mrf.mxu1 }
 0x15d   : > { %v684_v58 = vmax.f32 %v649_v53, 0.0 }
 0x162   : > { %v602_v54 = vpop.f32.mrf.mxu0 }
 0x163   : > { %v685_v56 = vmax.f32 %v602_v54, 0.0 }
 0x164   : > { %v651_v57 = vpop.f32.mrf.mxu1 }
 0x165   : > { %v686_v59 = vmax.f32 %v651_v57, 0.0  ;;  %v703_v60 = vpack.c.bf16 %v685_v56, %v683_v55 }
 0x167   : > { %v704_v61 = vpack.c.bf16 %v686_v59, %v684_v58  ;;  %745 = vmatmul.bf16.gmra.mxu2 %v703_v60 }
 0x169   : > { %794 = vmatmul.bf16.gmra.mxu3 %v704_v61 }
 0x16a   : > { %v605_v62 = vpop.f32.mrf.mxu0 }
 0x16b   : > { %v687_v1 = vmax.f32 %v605_v62, 0.0 }
 0x16c   : > { %v654_v63 = vpop.f32.mrf.mxu1 }
 0x16d   : > { %v688_v4 = vmax.f32 %v654_v63, 0.0 }
 0x172   : > { %v607_v0 = vpop.f32.mrf.mxu0 }
 0x173   : > { %v689_v2 = vmax.f32 %v607_v0, 0.0 }
 0x174   : > { %v656_v3 = vpop.f32.mrf.mxu1 }
 0x175   : > { %v690_v5 = vmax.f32 %v656_v3, 0.0  ;;  %v705_v6 = vpack.c.bf16 %v689_v2, %v687_v1 }
 0x177   : > { %v706_v7 = vpack.c.bf16 %v690_v5, %v688_v4  ;;  %750 = vmatmul.bf16.gmra.mxu2 %v705_v6 }
 0x179   : > { %799 = vmatmul.bf16.gmra.mxu3 %v706_v7 }
 0x18a   : > { %v716_v8 = vpop.f32.mrf.mxu2 }
 0x18c   : > { %v765_v9 = vpop.f32.mrf.mxu3 }
 0x18d   : > { %v766_v10 = vadd.f32 %v765_v9, %v716_v8 }
 0x18f   : > { %805 = vst [vmem:[%s1492_s24] sm:$0xff] %v766_v10 }
 0x192   : > { %v718_v11 = vpop.f32.mrf.mxu2 }
 0x194   : > { %v767_v12 = vpop.f32.mrf.mxu3 }
 0x195   : > { %v768_v13 = vadd.f32 %v767_v12, %v718_v11 }
 0x197   : > { %806 = vst [vmem:[%s1492_s24 + $0x8] sm:$0xff] %v768_v13 }
 0x19a   : > { %v721_v14 = vpop.f32.mrf.mxu2 }
 0x19c   : > { %v770_v15 = vpop.f32.mrf.mxu3 }
 0x19d   : > { %v771_v16 = vadd.f32 %v770_v15, %v721_v14 }
 0x19f   : > { %807 = vst [vmem:[%s1492_s24 + $0x10] sm:$0xff] %v771_v16 }
 0x1a2   : > { %v723_v17 = vpop.f32.mrf.mxu2 }
 0x1a4   : > { %v772_v18 = vpop.f32.mrf.mxu3 }
 0x1a5   : > { %v773_v19 = vadd.f32 %v772_v18, %v723_v17 }
 0x1a7   : > { %808 = vst [vmem:[%s1492_s24 + $0x18] sm:$0xff] %v773_v19 }
 0x1aa   : > { %v726_v20 = vpop.f32.mrf.mxu2 }
 0x1ac   : > { %v775_v21 = vpop.f32.mrf.mxu3 }
 0x1ad   : > { %v776_v22 = vadd.f32 %v775_v21, %v726_v20 }
 0x1af   : > { %809 = vst [vmem:[%s1492_s24 + $0x20] sm:$0xff] %v776_v22 }
 0x1b2   : > { %v728_v23 = vpop.f32.mrf.mxu2 }
 0x1b4   : > { %v777_v24 = vpop.f32.mrf.mxu3 }
 0x1b5   : > { %v778_v25 = vadd.f32 %v777_v24, %v728_v23 }
 0x1b7   : > { %810 = vst [vmem:[%s1492_s24 + $0x28] sm:$0xff] %v778_v25 }
 0x1ba   : > { %v731_v26 = vpop.f32.mrf.mxu2 }
 0x1bc   : > { %v780_v27 = vpop.f32.mrf.mxu3 }
 0x1bd   : > { %v781_v28 = vadd.f32 %v780_v27, %v731_v26 }
 0x1bf   : > { %811 = vst [vmem:[%s1492_s24 + $0x30] sm:$0xff] %v781_v28 }
 0x1c2   : > { %v733_v29 = vpop.f32.mrf.mxu2 }
 0x1c4   : > { %v782_v30 = vpop.f32.mrf.mxu3 }
 0x1c5   : > { %v783_v31 = vadd.f32 %v782_v30, %v733_v29 }
 0x1c7   : > { %812 = vst [vmem:[%s1492_s24 + $0x38] sm:$0xff] %v783_v31 }
 0x1ca   : > { %v736_v32 = vpop.f32.mrf.mxu2 }
 0x1cc   : > { %v785_v33 = vpop.f32.mrf.mxu3 }
 0x1cd   : > { %v786_v34 = vadd.f32 %v785_v33, %v736_v32 }
 0x1cf   : > { %813 = vst [vmem:[%s1492_s24 + $0x40] sm:$0xff] %v786_v34 }
 0x1d2   : > { %v738_v35 = vpop.f32.mrf.mxu2 }
 0x1d4   : > { %v787_v36 = vpop.f32.mrf.mxu3 }
 0x1d5   : > { %v788_v37 = vadd.f32 %v787_v36, %v738_v35 }
 0x1d7   : > { %814 = vst [vmem:[%s1492_s24 + $0x48] sm:$0xff] %v788_v37 }
 0x1da   : > { %v741_v38 = vpop.f32.mrf.mxu2 }
 0x1dc   : > { %v790_v39 = vpop.f32.mrf.mxu3 }
 0x1dd   : > { %v791_v40 = vadd.f32 %v790_v39, %v741_v38 }
 0x1df   : > { %815 = vst [vmem:[%s1492_s24 + $0x50] sm:$0xff] %v791_v40 }
 0x1e2   : > { %v743_v41 = vpop.f32.mrf.mxu2 }
 0x1e4   : > { %v792_v42 = vpop.f32.mrf.mxu3 }
 0x1e5   : > { %v793_v43 = vadd.f32 %v792_v42, %v743_v41 }
 0x1e7   : > { %816 = vst [vmem:[%s1492_s24 + $0x58] sm:$0xff] %v793_v43 }
 0x1ea   : > { %v746_v44 = vpop.f32.mrf.mxu2 }
 0x1ec   : > { %v795_v45 = vpop.f32.mrf.mxu3 }
 0x1ed   : > { %v796_v46 = vadd.f32 %v795_v45, %v746_v44 }
 0x1ef   : > { %817 = vst [vmem:[%s1492_s24 + $0x60] sm:$0xff] %v796_v46 }
 0x1f2   : > { %v748_v47 = vpop.f32.mrf.mxu2 }
 0x1f4   : > { %v797_v48 = vpop.f32.mrf.mxu3 }
 0x1f5   : > { %v798_v49 = vadd.f32 %v797_v48, %v748_v47 }
 0x1f7   : > { %818 = vst [vmem:[%s1492_s24 + $0x68] sm:$0xff] %v798_v49 }
 0x1fa   : > { %v751_v50 = vpop.f32.mrf.mxu2 }
 0x1fc   : > { %v800_v51 = vpop.f32.mrf.mxu3 }
 0x1fd   : > { %v801_v52 = vadd.f32 %v800_v51, %v751_v50 }
 0x1ff   : > { %819 = vst [vmem:[%s1492_s24 + $0x70] sm:$0xff] %v801_v52 }
 0x202   : > { %v753_v53 = vpop.f32.mrf.mxu2 }
 0x204   : > { %v802_v54 = vpop.f32.mrf.mxu3 }
 0x205   : > { %v803_v55 = vadd.f32 %v802_v54, %v753_v53 }
 0x207   : > { %820 = vst [vmem:[%s1492_s24 + $0x78] sm:$0xff] %v803_v55 }
 0x208   : > { %1242 = shalt.err (!%p1239_p10)
}
 0x209   : > { %s1299_s6 = smov 128   ;;  %s1300_s15 = smov 8  }
 0x20a   : > { %990 = dma.vmem_to_hbm [thread:$0]  (%p1421_p3), %s835_s10, 2048, %s837_s14, %s822_s7, %s1299_s6, %s1299_s6, %s1300_s15  }
 0x20b PF: > { %s851_s24 = sand.u32 1, %s1277_s18   ;;  %p1558_p12 = scmp.ge.s32.totalorder %s1289_s21, 2 }
 0x20c   : > { %s852_s29 = scalar_lea.sflag [#allocation4], %s851_s24 }
 0x20d   : > { %p1010_p13 = pnand %p1558_p12, %p1366_p6 }
 0x20f   : > { %p1011_p0 = pneg %p1010_p13 }
 0x211   : > { %1272 = dma.done.wait (%p1011_p0), %s852_s29, 2048  }
 0x212   : > { %1274 = vsyncadd (%p1011_p0), %s852_s29, 4294965248  ;;  %p20_p5 = scmp.ge.s32.totalorder %s1411_s13, 4   ;;  %s1559_s18 = smov %s1281_s19 }
 0x213   : > { %s1560_s19 = smov %s1285_s20  ;;  %s1561_s20 = smov %s1427_s26 }
 0x214   : > { %s1562_s21 = smov %s1411_s13  ;;  %22 = sbr.rel (!%p20_p5) target bundleno = 7 (0x7), region = 101 }
 0x219   :  { %858 = vsyncpa [#allocation3], 1 }
 0x21a   :  { %860 = vsyncpa [#allocation3 + $0x1], 1 }
 0x21b   :  { %861 = vsyncpa [#allocation6], 1 }
 0x21c   :  { %862 = vsyncpa [#allocation9], 1 }
 0x21d   :  { %863 = vsyncpa [#allocation4], 1 }
 0x21e   :  { %865 = vsyncpa [#allocation4 + $0x1], 1 }

</bundles_post_ra>
